<compile_context>
chip_gen: v5e
topology: v5e:2x2
jax: 0.10.0
libtpu: 0.0.40
codegen_flags: <defaults>
</compile_context>

<pallas_src>
import jax
import jax.numpy as jnp
from jax import lax
from jax.experimental import pallas as pl
from jax.experimental.pallas import tpu as pltpu


def _default_vmem_limit_bytes():
    """~80% of physical VMEM; falls back to 64 MiB if the query is unavailable."""
    try:
        cap = pltpu.get_tpu_info().vmem_capacity_bytes
        return int(cap * 0.8)
    except Exception:
        return 64 * 1024 * 1024


def attention_pallas(x, wqkv, wproj, bproj, num_heads, *,
                     block_q=None, return_weights=True, weights_dtype=None):
    """Forward pass of the PyTorch Attention module.

    Args:
      x:      (B, N, C) input.
      wqkv:   (3C, C)  nn.Linear weight of the fused qkv projection (no bias).
      wproj:  (C, C)   nn.Linear weight of the output projection.
      bproj:  (C,)     output projection bias.
      num_heads: number of attention heads H (C % H == 0).
      block_q: query-row tile size (None -> min(N, 512), clamped to divide N).
      return_weights: also return the (B, H, N, N) softmax attention weights.
      weights_dtype: dtype of the emitted weights (None -> x.dtype; use bf16 to
        halve the dominant HBM writeback when exact weights are not required).

    Returns: (out, weights) if return_weights else out.
    """
    B, N, C = x.shape
    H = num_heads
    assert C % H == 0
    hd = C // H
    scale = hd ** (-0.5)

    if weights_dtype is None:
        weights_dtype = x.dtype

    # Query tile: must divide N and (unless == N) be a multiple of 8 (f32
    # sublane tile).  Capped so per-step logits stay bounded for large N.
    if block_q is None:
        block_q = min(N, 512)
    if N % block_q != 0 or (block_q != N and block_q % 8 != 0):
        block_q = N
    nq = N // block_q

    # ---- one-time host-side weight re-layout (nn.Linear layouts in) ----
    wq, wk, wv = wqkv[:C], wqkv[C:2 * C], wqkv[2 * C:]
    # Q weight: (H*hd, C) -> (H, C, hd); fold the softmax scale in.
    wq_r = jnp.transpose(wq.reshape(H, hd, C), (0, 2, 1)) * jnp.asarray(scale, wq.dtype)
    # Fused K|V weight per head: (H, C, 2*hd); columns [:hd]=K, [hd:]=V.
    wkv_r = jnp.transpose(
        jnp.concatenate([wk.reshape(H, hd, C), wv.reshape(H, hd, C)], axis=1),
        (0, 2, 1))
    # Per-head slice of proj.T: (C, H*hd) view -> (H, hd, C); summing the
    # per-head partials ctx_h @ wp_r[h] over h equals concat(heads) @ Wp.T.
    wp_r = jnp.transpose(wproj.reshape(C, H, hd), (1, 2, 0))
    b2 = bproj.reshape(1, C)

    def kernel(x_ref, wq_ref, wkv_ref, wp_ref, b_ref, out_ref, *rest):
        if return_weights:
            wts_ref, acc_ref = rest
        else:
            (acc_ref,) = rest

        qt = pl.program_id(1)
        h = pl.program_id(2)
        last_h = pl.num_programs(2) - 1

        x_full = x_ref[0]                                        # (N, C)
        if nq == 1:
            x_q = x_full                                         # (TQ=N, C)
        else:
            row0 = pl.multiple_of(qt * block_q, block_q)
            x_q = x_ref[0, pl.ds(row0, block_q), :]              # (TQ, C)

        # Per-head projections; weights are resident and pre-transposed, scale
        # already folded into wq_r.  K/V come from one fused dot.
        q = jnp.dot(x_q, wq_ref[h], preferred_element_type=jnp.float32)      # (TQ, hd)
        kv = jnp.dot(x_full, wkv_ref[h], preferred_element_type=jnp.float32) # (N, 2hd)
        k = kv[:, :hd]                                            # (N, hd)
        v = kv[:, hd:]                                            # (N, hd)

        # q @ k^T without materializing a transpose: contract the last dims.
        s = lax.dot_general(q, k, (((1,), (1,)), ((), ())),
                            preferred_element_type=jnp.float32)   # (TQ, N)

        # Numerically-stable softmax in f32 (multiply-by-reciprocal form).
        s = s - jnp.max(s, axis=-1, keepdims=True)
        p = jnp.exp(s)
        p = p * pl.reciprocal(jnp.sum(p, axis=-1, keepdims=True), approx=False)

        if return_weights:
            wts_ref[0, 0] = p.astype(wts_ref.dtype)               # (TQ, N)

        ctx = jnp.dot(p, v, preferred_element_type=jnp.float32)   # (TQ, hd)
        partial = jnp.dot(ctx, wp_ref[h],
                          preferred_element_type=jnp.float32)     # (TQ, C)

        @pl.when(h == 0)
        def _():
            # Init with the broadcast bias: removes the finalize add.
            acc_ref[...] = jnp.broadcast_to(b_ref[...], acc_ref.shape
                                            ).astype(jnp.float32)

        acc_ref[...] += partial

        @pl.when(h == last_h)
        def _():
            out_ref[0] = acc_ref[...].astype(out_ref.dtype)

    in_specs = [
        pl.BlockSpec((1, N, C), lambda b, q, h: (b, 0, 0)),        # x (per batch)
        pl.BlockSpec((H, C, hd), lambda b, q, h: (0, 0, 0)),       # wq_r  (resident)
        pl.BlockSpec((H, C, 2 * hd), lambda b, q, h: (0, 0, 0)),   # wkv_r (resident)
        pl.BlockSpec((H, hd, C), lambda b, q, h: (0, 0, 0)),       # wp_r  (resident)
        pl.BlockSpec((1, C), lambda b, q, h: (0, 0)),              # bias  (resident)
    ]
    out_spec_main = pl.BlockSpec((1, block_q, C), lambda b, q, h: (b, q, 0))
    if return_weights:
        out_shape = (jax.ShapeDtypeStruct((B, N, C), x.dtype),
                     jax.ShapeDtypeStruct((B, H, N, N), weights_dtype))
        out_specs = [out_spec_main,
                     pl.BlockSpec((1, 1, block_q, N), lambda b, q, h: (b, h, q, 0))]
    else:
        out_shape = jax.ShapeDtypeStruct((B, N, C), x.dtype)
        out_specs = out_spec_main

    grid_spec = pltpu.PrefetchScalarGridSpec(
        num_scalar_prefetch=0,
        grid=(B, nq, H),
        in_specs=in_specs,
        out_specs=out_specs,
        scratch_shapes=[pltpu.VMEM((block_q, C), jnp.float32)],    # f32 accumulator
    )

    return pl.pallas_call(
        kernel,
        out_shape=out_shape,
        grid_spec=grid_spec,
        compiler_params=pltpu.CompilerParams(
            dimension_semantics=("parallel", "parallel", "arbitrary"),
            vmem_limit_bytes=_default_vmem_limit_bytes()),
    )(x, wq_r, wkv_r, wp_r, b2)


def attention_reference(x, wqkv, wproj, bproj, num_heads):
    """Plain-JAX reference matching the PyTorch forward exactly."""
    B, N, C = x.shape
    hd = C // num_heads
    scale = hd ** (-0.5)
    qkv = jnp.einsum('bnc,oc->bno', x, wqkv)                       # (B, N, 3C)
    qkv = qkv.reshape(B, N, 3, num_heads, hd).transpose(2, 0, 3, 1, 4)
    q, k, v = qkv[0], qkv[1], qkv[2]                               # (B, H, N, hd)
    attn = jnp.einsum('bhnd,bhmd->bhnm', q, k) * scale
    attn = jax.nn.softmax(attn, axis=-1)
    ctx = jnp.einsum('bhnm,bhmd->bhnd', attn, v)
    ctx = ctx.transpose(0, 2, 1, 3).reshape(B, N, C)
    out = jnp.einsum('bnc,oc->bno', ctx, wproj) + bproj
    return out, attn


if __name__ == "__main__":
    B, N, C, H = 2, 16, 32, 4

    key = jax.random.PRNGKey(0)
    kx, kqkv, kw, kb = jax.random.split(key, 4)

    x = jax.random.normal(kx, (B, N, C), dtype=jnp.float32)
    # nn.Linear layouts: (out_features, in_features) + bias (out_features,)
    wqkv = jax.random.normal(kqkv, (3 * C, C), dtype=jnp.float32) * 0.05
    wproj = jax.random.normal(kw, (C, C), dtype=jnp.float32) * 0.05
    bproj = jax.random.normal(kb, (C,), dtype=jnp.float32) * 0.05

    ref_out, ref_w = attention_reference(x, wqkv, wproj, bproj, H)

    # Full-semantics path (weights emitted), with the query-tiling axis
    # exercised (N=16, TQ=8 -> two q-tiles).
    out, weights = attention_pallas(x, wqkv, wproj, bproj, H, block_q=8)
    out = jax.block_until_ready(out)
    weights = jax.block_until_ready(weights)
    assert out.shape == (B, N, C) and weights.shape == (B, H, N, N)
    assert jnp.allclose(out, ref_out, atol=1e-4, rtol=1e-4)
    assert jnp.allclose(weights, ref_w, atol=1e-4, rtol=1e-4)

    # Weights-free path (drops the dominant (B,H,N,N) HBM writeback).
    out_nw = attention_pallas(x, wqkv, wproj, bproj, H, block_q=8,
                              return_weights=False)
    out_nw = jax.block_until_ready(out_nw)
    assert jnp.allclose(out_nw, ref_out, atol=1e-4, rtol=1e-4)

    # TODO(synk): attn_drop / proj_drop with ratio 0.0 are identity (eval mode);
    # no dropout RNG is emitted.
    print("KERNEL_OK")
</pallas_src>

<mosaic_0001>
module attributes {stable_mosaic.version = 11 : i64} {
  func.func @kernel(%arg0: i32, %arg1: i32, %arg2: i32, %arg3: memref<1x16x32xf32, #tpu.memory_space<vmem>>, %arg4: memref<4x32x8xf32, #tpu.memory_space<vmem>>, %arg5: memref<4x32x16xf32, #tpu.memory_space<vmem>>, %arg6: memref<4x8x32xf32, #tpu.memory_space<vmem>>, %arg7: memref<1x32xf32, #tpu.memory_space<vmem>>, %arg8: memref<1x8x32xf32, #tpu.memory_space<vmem>>, %arg9: memref<1x1x8x16xf32, #tpu.memory_space<vmem>>, %arg10: memref<8x32xf32, #tpu.memory_space<vmem>>) attributes {dimension_semantics = [#tpu.dimension_semantics<parallel>, #tpu.dimension_semantics<parallel>, #tpu.dimension_semantics<arbitrary>], iteration_bounds = array<i64: 2, 2, 4>, scalar_prefetch = 0 : i64, scratch_operands = 1 : i64, tpu.core_type = #tpu.core_type<tc>, window_params = [{transform_indices = @transform_0, window_bounds = array<i64: 1, 16, 32>}, {pipeline_mode = #tpu.pipeline_mode<synchronous>, transform_indices = @transform_1, window_bounds = array<i64: 4, 32, 8>}, {pipeline_mode = #tpu.pipeline_mode<synchronous>, transform_indices = @transform_2, window_bounds = array<i64: 4, 32, 16>}, {pipeline_mode = #tpu.pipeline_mode<synchronous>, transform_indices = @transform_3, window_bounds = array<i64: 4, 8, 32>}, {pipeline_mode = #tpu.pipeline_mode<synchronous>, transform_indices = @transform_4, window_bounds = array<i64: 1, 32>}, {transform_indices = @transform_5, window_bounds = array<i64: 1, 8, 32>}, {transform_indices = @transform_6, window_bounds = array<i64: 1, 1, 8, 16>}]} {
    %c0 = arith.constant 0 : index
    %c0_0 = arith.constant 0 : index
    %c0_1 = arith.constant 0 : index
    %0 = vector.load %arg3[%c0, %c0_0, %c0_1] : memref<1x16x32xf32, #tpu.memory_space<vmem>>, vector<1x16x32xf32>
    %1 = vector.shape_cast %0 : vector<1x16x32xf32> to vector<16x32xf32>
    %c8_i32 = arith.constant 8 : i32
    %2 = arith.muli %arg1, %c8_i32 : i32
    %3 = tpu.assume_multiple %2, 8 : i32
    %c0_2 = arith.constant 0 : index
    %4 = arith.index_cast %3 : i32 to index
    %c0_3 = arith.constant 0 : index
    %5 = vector.load %arg3[%c0_2, %4, %c0_3] : memref<1x16x32xf32, #tpu.memory_space<vmem>>, vector<1x8x32xf32>
    %6 = vector.shape_cast %5 : vector<1x8x32xf32> to vector<8x32xf32>
    %7 = arith.index_cast %arg2 : i32 to index
    %c0_4 = arith.constant 0 : index
    %c0_5 = arith.constant 0 : index
    %8 = vector.load %arg4[%7, %c0_4, %c0_5] : memref<4x32x8xf32, #tpu.memory_space<vmem>>, vector<1x32x8xf32>
    %9 = vector.shape_cast %8 : vector<1x32x8xf32> to vector<32x8xf32>
    %cst = arith.constant dense<0.000000e+00> : vector<8x8xf32>
    %10 = tpu.matmul %6, %9, %cst {dimension_numbers = #tpu.dot_dimension_numbers<[1], [0], [0], [1], [0, 0, 1, 1], [], []>} : vector<8x32xf32>, vector<32x8xf32>, vector<8x8xf32> -> vector<8x8xf32>
    %11 = arith.index_cast %arg2 : i32 to index
    %c0_6 = arith.constant 0 : index
    %c0_7 = arith.constant 0 : index
    %12 = vector.load %arg5[%11, %c0_6, %c0_7] : memref<4x32x16xf32, #tpu.memory_space<vmem>>, vector<1x32x16xf32>
    %13 = vector.shape_cast %12 : vector<1x32x16xf32> to vector<32x16xf32>
    %cst_8 = arith.constant dense<0.000000e+00> : vector<16x16xf32>
    %14 = tpu.matmul %1, %13, %cst_8 {dimension_numbers = #tpu.dot_dimension_numbers<[1], [0], [0], [1], [0, 0, 1, 1], [], []>} : vector<16x32xf32>, vector<32x16xf32>, vector<16x16xf32> -> vector<16x16xf32>
    %15 = vector.extract_strided_slice %14 {offsets = [0, 0], sizes = [16, 8], strides = [1, 1]} : vector<16x16xf32> to vector<16x8xf32>
    %16 = vector.extract_strided_slice %14 {offsets = [0, 8], sizes = [16, 8], strides = [1, 1]} : vector<16x16xf32> to vector<16x8xf32>
    %cst_9 = arith.constant dense<0.000000e+00> : vector<8x16xf32>
    %17 = tpu.matmul %10, %15, %cst_9 {dimension_numbers = #tpu.dot_dimension_numbers<[1], [1], [0], [0], [0, 0, 1, 0], [], []>} : vector<8x8xf32>, vector<16x8xf32>, vector<8x16xf32> -> vector<8x16xf32>
    %cst_10 = arith.constant dense<0xFF800000> : vector<8xf32>
    %18 = vector.multi_reduction <maximumf>, %17, %cst_10 [1] : vector<8x16xf32> to vector<8xf32>
    %19 = vector.shape_cast %18 : vector<8xf32> to vector<8x1xf32>
    %20 = vector.broadcast %19 : vector<8x1xf32> to vector<8x16xf32>
    %21 = arith.subf %17, %20 : vector<8x16xf32>
    %22 = math.exp %21 : vector<8x16xf32>
    %cst_11 = arith.constant dense<0.000000e+00> : vector<8xf32>
    %23 = vector.multi_reduction <add>, %22, %cst_11 [1] : vector<8x16xf32> to vector<8xf32>
    %24 = vector.shape_cast %23 : vector<8xf32> to vector<8x1xf32>
    %25 = tpu.reciprocal %24 : vector<8x1xf32> -> vector<8x1xf32>
    %26 = vector.broadcast %25 : vector<8x1xf32> to vector<8x16xf32>
    %27 = arith.mulf %22, %26 : vector<8x16xf32>
    %c0_12 = arith.constant 0 : index
    %c0_13 = arith.constant 0 : index
    %c0_14 = arith.constant 0 : index
    %c0_15 = arith.constant 0 : index
    %28 = vector.load %arg9[%c0_12, %c0_13, %c0_14, %c0_15] : memref<1x1x8x16xf32, #tpu.memory_space<vmem>>, vector<1x1x8x16xf32>
    %29 = vector.shape_cast %28 : vector<1x1x8x16xf32> to vector<8x16xf32>
    %30 = vector.shape_cast %27 : vector<8x16xf32> to vector<1x1x8x16xf32>
    tpu.vector_store %arg9[%c0_12, %c0_13, %c0_14, %c0_15], %30 {strides = array<i32>} : memref<1x1x8x16xf32, #tpu.memory_space<vmem>>, vector<1x1x8x16xf32>,
    %cst_16 = arith.constant dense<0.000000e+00> : vector<8x8xf32>
    %31 = tpu.matmul %27, %16, %cst_16 {dimension_numbers = #tpu.dot_dimension_numbers<[1], [0], [0], [1], [0, 0, 1, 1], [], []>} : vector<8x16xf32>, vector<16x8xf32>, vector<8x8xf32> -> vector<8x8xf32>
    %32 = arith.index_cast %arg2 : i32 to index
    %c0_17 = arith.constant 0 : index
    %c0_18 = arith.constant 0 : index
    %33 = vector.load %arg6[%32, %c0_17, %c0_18] : memref<4x8x32xf32, #tpu.memory_space<vmem>>, vector<1x8x32xf32>
    %34 = vector.shape_cast %33 : vector<1x8x32xf32> to vector<8x32xf32>
    %cst_19 = arith.constant dense<0.000000e+00> : vector<8x32xf32>
    %35 = tpu.matmul %31, %34, %cst_19 {dimension_numbers = #tpu.dot_dimension_numbers<[1], [0], [0], [1], [0, 0, 1, 1], [], []>} : vector<8x8xf32>, vector<8x32xf32>, vector<8x32xf32> -> vector<8x32xf32>
    %c0_i32 = arith.constant 0 : i32
    %36 = arith.cmpi eq, %arg2, %c0_i32 : i32
    %37 = arith.extui %36 : i1 to i32
    %c0_i32_20 = arith.constant 0 : i32
    %38 = arith.cmpi ne, %37, %c0_i32_20 : i32
    scf.if %38 {
      %c0_26 = arith.constant 0 : index
      %c0_27 = arith.constant 0 : index
      %45 = vector.load %arg7[%c0_26, %c0_27] : memref<1x32xf32, #tpu.memory_space<vmem>>, vector<1x32xf32>
      %46 = vector.shape_cast %45 : vector<1x32xf32> to vector<1x32xf32>
      %47 = vector.broadcast %46 : vector<1x32xf32> to vector<8x32xf32>
      %c0_28 = arith.constant 0 : index
      %c0_29 = arith.constant 0 : index
      %48 = vector.load %arg10[%c0_28, %c0_29] : memref<8x32xf32, #tpu.memory_space<vmem>>, vector<8x32xf32>
      tpu.vector_store %arg10[%c0_28, %c0_29], %47 {strides = array<i32>} : memref<8x32xf32, #tpu.memory_space<vmem>>, vector<8x32xf32>,
    } else {
    }
    %c0_21 = arith.constant 0 : index
    %c0_22 = arith.constant 0 : index
    %39 = vector.load %arg10[%c0_21, %c0_22] : memref<8x32xf32, #tpu.memory_space<vmem>>, vector<8x32xf32>
    %40 = arith.addf %39, %35 : vector<8x32xf32>
    %c0_23 = arith.constant 0 : index
    %c0_24 = arith.constant 0 : index
    %41 = vector.load %arg10[%c0_23, %c0_24] : memref<8x32xf32, #tpu.memory_space<vmem>>, vector<8x32xf32>
    tpu.vector_store %arg10[%c0_23, %c0_24], %40 {strides = array<i32>} : memref<8x32xf32, #tpu.memory_space<vmem>>, vector<8x32xf32>,
    %c3_i32 = arith.constant 3 : i32
    %42 = arith.cmpi eq, %arg2, %c3_i32 : i32
    %43 = arith.extui %42 : i1 to i32
    %c0_i32_25 = arith.constant 0 : i32
    %44 = arith.cmpi ne, %43, %c0_i32_25 : i32
    scf.if %44 {
      %c0_26 = arith.constant 0 : index
      %c0_27 = arith.constant 0 : index
      %45 = vector.load %arg10[%c0_26, %c0_27] : memref<8x32xf32, #tpu.memory_space<vmem>>, vector<8x32xf32>
      %c0_28 = arith.constant 0 : index
      %c0_29 = arith.constant 0 : index
      %c0_30 = arith.constant 0 : index
      %46 = vector.load %arg8[%c0_28, %c0_29, %c0_30] : memref<1x8x32xf32, #tpu.memory_space<vmem>>, vector<1x8x32xf32>
      %47 = vector.shape_cast %46 : vector<1x8x32xf32> to vector<8x32xf32>
      %48 = vector.shape_cast %45 : vector<8x32xf32> to vector<1x8x32xf32>
      tpu.vector_store %arg8[%c0_28, %c0_29, %c0_30], %48 {strides = array<i32>} : memref<1x8x32xf32, #tpu.memory_space<vmem>>, vector<1x8x32xf32>,
    } else {
    }
    return
  }
  func.func @transform_0(%arg0: i32, %arg1: i32, %arg2: i32) -> (i32, i32, i32) {
    %c0_i32 = arith.constant 0 : i32
    %c0_i32_0 = arith.constant 0 : i32
    %c0_i32_1 = arith.constant 0 : i32
    return %arg0, %c0_i32, %c0_i32_0 : i32, i32, i32
  }
  func.func @transform_1(%arg0: i32, %arg1: i32, %arg2: i32) -> (i32, i32, i32) {
    %c0_i32 = arith.constant 0 : i32
    %c0_i32_0 = arith.constant 0 : i32
    %c0_i32_1 = arith.constant 0 : i32
    %c0_i32_2 = arith.constant 0 : i32
    return %c0_i32, %c0_i32_0, %c0_i32_1 : i32, i32, i32
  }
  func.func @transform_2(%arg0: i32, %arg1: i32, %arg2: i32) -> (i32, i32, i32) {
    %c0_i32 = arith.constant 0 : i32
    %c0_i32_0 = arith.constant 0 : i32
    %c0_i32_1 = arith.constant 0 : i32
    %c0_i32_2 = arith.constant 0 : i32
    return %c0_i32, %c0_i32_0, %c0_i32_1 : i32, i32, i32
  }
  func.func @transform_3(%arg0: i32, %arg1: i32, %arg2: i32) -> (i32, i32, i32) {
    %c0_i32 = arith.constant 0 : i32
    %c0_i32_0 = arith.constant 0 : i32
    %c0_i32_1 = arith.constant 0 : i32
    %c0_i32_2 = arith.constant 0 : i32
    return %c0_i32, %c0_i32_0, %c0_i32_1 : i32, i32, i32
  }
  func.func @transform_4(%arg0: i32, %arg1: i32, %arg2: i32) -> (i32, i32) {
    %c0_i32 = arith.constant 0 : i32
    %c0_i32_0 = arith.constant 0 : i32
    %c0_i32_1 = arith.constant 0 : i32
    return %c0_i32, %c0_i32_0 : i32, i32
  }
  func.func @transform_5(%arg0: i32, %arg1: i32, %arg2: i32) -> (i32, i32, i32) {
    %c0_i32 = arith.constant 0 : i32
    %c0_i32_0 = arith.constant 0 : i32
    return %arg0, %arg1, %c0_i32 : i32, i32, i32
  }
  func.func @transform_6(%arg0: i32, %arg1: i32, %arg2: i32) -> (i32, i32, i32, i32) {
    %c0_i32 = arith.constant 0 : i32
    %c0_i32_0 = arith.constant 0 : i32
    return %arg0, %arg2, %arg1, %c0_i32 : i32, i32, i32, i32
  }
}

</mosaic_0001>

<bundles_post_ra>
// kernel: tpu_custom_call.1
= control target key start
LH: loop header
LB: loop body
LE: loop exit
PB: predicated region body
PF: predicated region fallthrough
CT: control target
= control target key end

     0   :  { %s1286_s0 = inlined_call_operand.vmem [shape: f32[2,16,32], index: 0, kind: input, shape index: {}]   ;;  %s1287_s1 = inlined_call_operand.vmem [shape: f32[4,32,8], index: 1, kind: input, shape index: {}]   ;;  %s1288_s2 = inlined_call_operand.vmem [shape: f32[4,32,16], index: 2, kind: input, shape index: {}]   ;;  %s1289_s3 = inlined_call_operand.vmem [shape: f32[4,8,32], index: 3, kind: input, shape index: {}]   ;;  %s1290_s4 = inlined_call_operand.vmem [shape: f32[1,32], index: 4, kind: input, shape index: {}]   ;;  %s1291_s5 = inlined_call_operand.hbm [shape: f32[2,16,32], index: 5, kind: output, shape index: {0}]   ;;  %s1292_s6 = inlined_call_operand.hbm [shape: f32[2,4,16,16], index: 6, kind: output, shape index: {1}]  }
   0x1   :  { %1305 = sst [smem:[#allocation20_spill]] %s1286_s0 }
   0x2   :  { %1306 = sst [smem:[#allocation21_spill]] %s1287_s1 }
   0x3   :  { %1307 = sst [smem:[#allocation22_spill]] %s1288_s2 }
   0x4   :  { %12 = vsyncpa [#allocation4], 0 }
   0x5   :  { %14 = vsyncpa [#allocation4 + $0x1], 0 }
   0x6   :  { %15 = vsyncpa [#allocation6], 0 }
   0x7   :  { %17 = vsyncpa [#allocation6 + $0x1], 0  ;;  %s1011_s21 = smov 0   ;;  %s1013_s22 = smov 0  }
   0x8   :  { %s1015_s23 = smov 0   ;;  %s1017_s24 = smov 0  }
   0x9   :  { %s1019_s25 = smov 0   ;;  %s1021_s26 = smov 0  }
   0xa   :  { %s1023_s27 = smov 0   ;;  %s1025_s28 = smov 0  }
   0xb   :  { %s1027_s29 = smov 0   ;;  %s1029_s30 = smov 0  }
   0xc   :  { %s1031_s7 = smov 0   ;;  %s1033_s8 = smov 0  }
   0xd   :  { %s1035_s9 = smov 0  }
   0xe LB: > { %1308 = sst [smem:[#allocation9_spill]] %s925_s21  ;;  %s648_s10 = sadd.s32 4294967295, %s973_s9   ;;  %s973_s9 = sphi %s1035_s9, %s23_s9   ;;  %s969_s8 = sphi %s1033_s8, %s1342_s8   ;;  %s965_s7 = sphi %s1031_s7, %s1349_s7   ;;  %s961_s30 = sphi %s1029_s30, %s1340_s30   ;;  %s957_s29 = sphi %s1027_s29, %s1339_s29   ;;  %s953_s28 = sphi %s1025_s28, %s1338_s28   ;;  %s949_s27 = sphi %s1023_s27, %s1337_s27   ;;  %s945_s26 = sphi %s1021_s26, %s1336_s26   ;;  %s941_s25 = sphi %s1019_s25, %s1348_s25   ;;  %s937_s24 = sphi %s1017_s24, %s1347_s24   ;;  %s933_s23 = sphi %s1015_s23, %s1346_s23   ;;  %s929_s22 = sphi %s1013_s22, %s1345_s22   ;;  %s925_s21 = sphi %s1011_s21, %s1344_s21  }
   0xf   : > { %1309 = sst [smem:[#allocation10_spill]] %s937_s24  ;;  %s649_s11 = sadd.s32 4294967294, %s973_s9  }
  0x10   : > { %1310 = sst [smem:[#allocation11_spill]] %s945_s26  ;;  %s35_s12 = sadd.s32 1, %s961_s30 }
  0x11   : > { %1311 = sst [smem:[#allocation12_spill]] %s961_s30  ;;  %s38_s13 = sadd.s32 1, %s965_s7 }
  0x12   : > { %1312 = sst [smem:[#allocation13_spill]] %s965_s7  ;;  %p36_p0 = scmp.ge.s32.totalorder %s35_s12, 4 }
  0x13   : > { %1313 = sst [smem:[#allocation14_spill]] %s969_s8  ;;  %s42_s14 = sadd.s32 1, %s969_s8 }
  0x14   : > { %p171_p1 = scmp.ne.s32.totalorder %s945_s26, %s941_s25  ;;  %s1351_s12 = smov (%p36_p0, %s35_s12), 0 }
  0x15   : > { %1314 = sst [smem:[#allocation15_spill]] %s1351_s12  ;;  %s1353_s13 = smov (!%p36_p0, %s38_s13), %s965_s7 }
  0x16   : > { %p1087_p2 = scmp.eq.s32.totalorder %s648_s10, 15  ;;  %p177_p3 = scmp.ne.s32.totalorder %s941_s25, %s937_s24 }
  0x17   : > { %p40_p4 = scmp.ge.s32.totalorder %s1353_s13, 2  ;;  %p1093_p5 = scmp.eq.s32.totalorder %s649_s11, 15 }
  0x18   : > { %p1099_p6 = por %p1087_p2, %p171_p1  ;;  %s185_s19 = ssub.s32 %s961_s30, %s1351_s12 }
  0x19   : > { %s1355_s13 = smov (%p40_p4, %s1353_s13), 0  ;;  %s1357_s14 = smov (!%p40_p4, %s42_s14), %s969_s8 }
  0x1a   : > { %1318 = sst [smem:[#allocation16_spill]] %s1355_s13  ;;  %s157_s20 = ssub.s32 %s965_s7, %s1355_s13 }
  0x1b   : > { %p1112_p7 = por %p1093_p5, %p177_p3  ;;  %p44_p8 = scmp.ge.s32.totalorder %s1357_s14, 2 }
  0x1c   : > { %s191_s11 = sadd.s32 1, %s933_s23  ;;  %p201_p9 = scmp.ne.s32.totalorder %s933_s23, %s929_s22 }
  0x1d   : > { %s1319_s10 = scalar_select %p1112_p7, 1, 0 }
  0x1e   : > { %p207_p10 = scmp.ne.s32.totalorder %s929_s22, %s925_s21  ;;  %s1359_s14 = smov (%p44_p8, %s1357_s14), 0 }
  0x1f   : > { %1320 = sst [smem:[#allocation17_spill]] %s1319_s10  ;;  %p1125_p11 = por %p201_p9, %p1087_p2 }
  0x20   : > { %1321 = sst [smem:[#allocation18_spill]] %s1359_s14  ;;  %p1131_p12 = por %p207_p10, %p1093_p5 }
  0x21   : > { %s156_s12 = ssub.s32 %s969_s8, %s1359_s14  ;;  %p652_p13 = scmp.ge.s32.totalorder %s973_s9, 1 }
  0x22   : > { %s158_s7 = sor.u32 %s157_s20, %s156_s12  ;;  %s186_s30 = sor.u32 %s185_s19, %s156_s12 }
  0x23   : > { %p159_p0 = scmp.eq.s32.totalorder %s158_s7, 0  ;;  %s188_s10 = sor.u32 %s186_s30, %s157_s20 }
  0x24   : > { %p189_p1 = scmp.eq.s32.totalorder %s188_s10, 0  ;;  %p246_p3 = scmp.lt.s32.totalorder %s973_s9, 17 }
  0x25   : > { %s1324_s21 = sadd.s32 1, %s945_s26 }
  0x26   : > { %s1142_s16 = scalar_select %p159_p0, %s945_s26, %s1324_s21  }
  0x27   : > { %s1145_s24 = scalar_select %p189_p1, %s933_s23, %s191_s11  }
  0x28   : > { %1325 = sst [smem:[#allocation19_spill]] %s1142_s16  ;;  %p247_p2 = pnand %p652_p13, %p246_p3 }
  0x29   : > { %s658_s17 = sshll.u32 (!%p247_p2), %s949_s27, 5  ;;  %p281_p4 = scmp.lt.s32.totalorder (!%p247_p2), %s957_s29, 1 }
  0x2a   : > { %250 = sbr.rel (%p247_p2) target bundleno = 912 (0x390), region = 40  ;;  %s1326_s2 = sld [smem:[#allocation22_spill]] (!%p247_p2) }
  0x2b   : > { %s271_s7 = sand.u32 (!%p247_p2), 1, %s941_s25   ;;  %s1327_s1 = sld [smem:[#allocation21_spill]] (!%p247_p2) }
  0x2c   : > { %s1156_s19 = sshll.u32 (!%p247_p2), %s271_s7, 3  ;;  %s1328_s0 = sld [smem:[#allocation20_spill]] (!%p247_p2) }
  0x2d   : > { %s657_s16 = sshll.u32 (!%p247_p2), %s953_s28, 3  ;;  %s273_s10 = scalar_lea.vmem (!%p247_p2), [#allocation3], %s1156_s19 }
  0x2e   : > { %p668_p5 = scmp.ne.s32.totalorder (!%p247_p2), %s949_s27, 0 }
  0x2f   : > { %s282_s21 = scalar_select %p281_p4, %s957_s29, 1  ;;  %vm297_vm0 = vcmask 261120   ;;  %vm355_vm1 = vcmask 64512   ;;  %vm385_vm2 = vcmask 130048  }
  0x30   : > { %s321_s30 = scalar_lea.vmem %s1326_s2, %s658_s17 }
  0x31   : > { %v325_v0 = vld [vmem:[%s321_s30 + $0x18] sm:$0xff]  ;;  %v324_v1 = vld [vmem:[%s321_s30 + $0x10] sm:$0xff]  ;;  %s292_s11 = scalar_lea.vmem %s1327_s1, %s658_s17  ;;  %v323_v2 = vld [vmem:[%s321_s30 + $0x8] sm:$0xff]  ;;  %s679_s8 = sshll.u32 %s282_s21, 4 }
  0x32   : > { %344 = vmatpush.msra.mxu1 %v325_v0  ;;  %v296_v3 = vld [vmem:[%s292_s11 + $0x18] sm:$0xff]  ;;  %v295_v4 = vld [vmem:[%s292_s11 + $0x10] sm:$0xff]  ;;  %s285_s2 = scalar_lea.vmem %s1328_s0, %s679_s8  ;;  %v322_v5 = vld [vmem:[%s321_s30] sm:$0xff]  ;;  %s975_s8 = smov 120  }
  0x33   : > { %313 = vmatpush.msra.mxu0 %v296_v3  ;;  %v294_v6 = vld [vmem:[%s292_s11 + $0x8] sm:$0xff]  ;;  %s289_s26 = scalar_lea.vmem %s285_s2, %s657_s16  ;;  %v286_v7 = vld [vmem:[%s285_s2] sm:$0xff]  ;;  %s1303_s30 = sand.u32 1, %s929_s22  }
  0x34   : > { %345 = vmatpush.msra.mxu1 %v324_v1  ;;  %v293_v8 = vld [vmem:[%s292_s11] sm:$0xff]  ;;  %v287_v10 = vld [vmem:[%s285_s2 + $0x8] sm:$0xff]  ;;  %s666_s2 = sshll.u32 %s949_s27, 3  ;;  %s1180_s21 = sshll.u32 %s1303_s30, 3 }
  0x35   : > { %314 = vmatpush.msra.mxu0 %v295_v4  ;;  %v290_v9 = vld [vmem:[%s289_s26] sm:$0xff]  ;;  %s441_s17 = scalar_lea.vmem %s1289_s3, %s666_s2  ;;  %s1304_s20 = scalar_lea.vmem [#allocation5], %s1180_s21 }
  0x36   : > { %346 = vmatpush.msra.mxu1 %v323_v2  ;;  %v442_v25 = vld [vmem:[%s441_s17] sm:$0xff] }
  0x37   : > { %315 = vmatpush.msra.mxu0 %v294_v6 }
  0x38   : > { %347 = vmatpush.msra.mxu1 %v322_v5 }
  0x39   : > { %660 = vmatmul.msk.f32.vlgmr.msra.gmra.mxu1 %vm297_vm0, %v286_v7  ;;  %316 = vmatpush.msra.mxu0 %v293_v8 }
  0x3a   : > { %659 = vmatmul.msk.f32.vlgmr.msra.gmra.mxu0 %vm297_vm0, %v290_v9 }
  0x41   : > { %661 = vmatmul.msk.f32.gmra.mxu1 %vm297_vm0, %v287_v10 }
  0xb6   : > { %v349_v11 = vpop.f32.mrf.mxu1 }
  0xb7   : > { %v318_v14 = vpop.f32.mrf.mxu0 }
  0xbe   : > { %v352_v12 = vpop.f32.mrf.mxu1 }
  0xbf   : > { %v797_v13 = vpack.i.bf16 %v349_v11, %v352_v12  ;;  %662 = vmatpush.xpose.msk.msra.mxu2 %vm355_vm1, %v352_v12 }
  0xc1   : > { %798 = vrot.lane.b32.xlu1 %v797_v13, %s975_s8 }
  0xc3   : > { %663 = vmatpush.xpose.msk.msra.mxu2 %vm355_vm1, %v349_v11 }
  0xc6   : > { %664 = vmatmul.msk.f32.vlgmr.msra.gmra.mxu2 %vm355_vm1, %v318_v14 }
 0x133   : > { %v799_v15 = vpop.permute.xlu1 %798 }
 0x134   : > { %v800_v16 = vunpack.i.l.bf16 %v799_v15  ;;  %v801_v17 = vunpack.i.h.bf16 %v799_v15 }
 0x136   : > { %434 = vmatpush.msra.mxu3 %v800_v16 }
 0x138   : > { %435 = vmatpush.msra.mxu3 %v801_v17 }
 0x13a   : > { %461 = vmatpush.msrb.mxu3 %v442_v25 }
 0x149   : > { %v382_v18 = vpop.f32.mrf.mxu2 }
 0x14a   : > { %v386_v19 = vsel %vm385_vm2, %v382_v18, -inf }
 0x14b   : > { %387 = vmax.xlane.f32.xlu0 %v386_v19 }
 0x1be   : > { %v388_v20 = vpop.xlane.xlu0 %387 }
 0x1bf   : > { %v389_v21 = vsub.f32 %v382_v18, %v388_v20 }
 0x1c1   : > { %v390_v22 = vmul.f32 1.442695, %v389_v21 }
 0x1c3   : > { %802 = vpow2.f32 %v390_v22 }
 0x1c9   : > { %v803_v23 = vpop.eup %802 }
 0x1ca   : > { %v392_v24 = vsel %vm385_vm2, %v803_v23, 0.0 }
 0x1cb   : > { %393 = vadd.xlane.f32.xlu0 %v392_v24 }
 0x23e   : > { %v394_v26 = vpop.xlane.xlu0 %393 }
 0x23f   : > { %804 = vrcp.f32 %v394_v26  ;;  %v406_v30 = vand.u32 2147483648, %v394_v26  ;;  %v404_v32 = vand.u32 2147483647, %v394_v26  ;;  %vm400_vm4 = vweird.f32 %v394_v26 }
 0x241   : > { %v407_v34 = vor.u32 1.1754944e-38, %v406_v30  ;;  %vm405_vm6 = vcmp.eq.f32.partialorder %v404_v32, 8.507059e+37 }
 0x245   : > { %v805_v27 = vpop.eup %804 }
 0x246   : > { %v396_v28 = vmul.f32 %v805_v27, %v394_v26  ;;  %vm401_vm3 = vweird.f32 %v805_v27 }
 0x247   : > { %vm402_vm5 = vmor %vm400_vm4, %vm401_vm3 }
 0x248   : > { %v397_v29 = vsub.f32 1.0, %v396_v28 }
 0x24a   : > { %v398_v31 = vmul.f32 %v805_v27, %v397_v29 }
 0x24c   : > { %v399_v33 = vadd.f32 %v805_v27, %v398_v31 }
 0x24e   : > { %v403_v35 = vsel %vm402_vm5, %v805_v27, %v399_v33 }
 0x24f   : > { %v408_v36 = vsel %vm405_vm6, %v407_v34, %v403_v35 }
 0x250   : > { %v409_v37 = vmul.f32 %v803_v23, %v408_v36 }
 0x252   : > { %410 = vst.msk [vmem:[%s1304_s20] sm:$0xff] %vm385_vm2, %v409_v37  ;;  %665 = vmatmul.msk.f32.vlgmr.msra.gmra.mxu3 %vm385_vm2, %v409_v37 }
 0x2d5   : > { %v437_v38 = vpop.f32.mrf.mxu3 }
 0x2d6   : > { %667 = vmatmul.msk.f32.vlgmr.msrb.gmra.mxu3 %vm355_vm1, %v437_v38 }
 0x355   : > { %469 = sbr.rel (%p668_p5) target bundleno = 860 (0x35c), region = 44 }
 0x359   : > { %v463_v39 = vpop.f32.mrf.mxu3 }
 0x35a   : > { %v806_v40 = vld [vmem:[%s1290_s4] ss:$0 sm:$0xff] }
 0x35b   : > { %474 = vst.msk [vmem:[#allocation2] sm:$0xff] %vm297_vm0, %v806_v40 }
 0x35c PF: > { %p669_p8 = scmp.ne.s32.totalorder %s949_s27, 3 }
 0x361   : > { %481 = sbr.rel (%p669_p8) target bundleno = 878 (0x36e), region = 48 }
 0x362   : > { %v475_v41 = vld [vmem:[#allocation2] sm:$0xff] }
 0x363   : > { %v476_v42 = vadd.f32 %v475_v41, %v463_v39 }
 0x365   : > { %477 = vst.msk [vmem:[#allocation2] sm:$0xff] %vm297_vm0, %v476_v42 }
 0x36c   : > { %v482_v43 = vld [vmem:[#allocation2] sm:$0xff] }
 0x36d   : > { %483 = vst.msk [vmem:[%s273_s10] sm:$0xff] %vm297_vm0, %v482_v43 }
 0x36e PF: > { %s672_s19 = sshll.u32 %s957_s29, 1  ;;  %s504_s8 = sshll.u32 %s273_s10, 4  ;;  %s505_s8 = int_to_ptr.vmem [resolvable:$true] %s504_s8 }
 0x36f   : > { %s500_s12 = sadd.s32 %s953_s28, %s672_s19  ;;  %s674_s14 = sshll.u32 %s949_s27, 1 }
 0x370   : > { %s673_s2 = sshll.u32 %s500_s12, 3  ;;  %s516_s30 = sadd.s32 %s953_s28, %s674_s14 }
 0x371   : > { %s502_s17 = scalar_lea.hbm %s1291_s5, %s673_s2  ;;  %s485_s20 = scalar_lea.sflag [#allocation4], %s271_s7 }
 0x372   : > { %s506_s11 = sshll.u32 %s502_s17, 4  ;;  %s827_s12 = scalar_lea.hbm %s1291_s5, 32  ;;  %s507_s11 = int_to_ptr.hbm [resolvable:$true] %s506_s11 }
 0x373   : > { %s821_s0 = sshra.s32 %s507_s11, 4  ;;  %s822_s0 = int_to_ptr.hbm [resolvable:$true] %s821_s0 }
 0x374   : > { %s823_s1 = scalar_lea.hbm %s822_s0, 8  ;;  %p828_p0 = scmp.lt.s32.totalorder %s822_s0, %s1291_s5 }
 0x375   : > { %p824_p9 = scmp.ne.s32.totalorder %s822_s0, %s823_s1  ;;  %p829_p1 = scmp.lt.s32.totalorder %s827_s12, %s823_s1 }
 0x377   : > { %p825_p10 = pnand %p824_p9, %p1099_p6  ;;  %p830_p3 = por %p829_p1, %p828_p0 }
 0x379   : > { %p826_p13 = pneg %p825_p10 }
 0x37b   : > { %p831_p2 = pnand %p830_p3, %p826_p13 }
 0x37d   : > { %834 = shalt.err (!%p831_p2)
}
 0x37e   : > { %680 = dma.vmem_to_hbm [thread:$0]  (%p1099_p6), %s505_s8, 128, %s507_s11, %s485_s20  }
 0x37f   : > { %s675_s27 = sshll.u32 %s957_s29, 3  ;;  %s1329_s28 = scalar_lea.vmem [#allocation5], %s1180_s21 }
 0x380   : > { %s522_s7 = sshll.u32 %s1329_s28, 4  ;;  %s518_s16 = sadd.s32 %s675_s27, %s516_s30  ;;  %s523_s7 = int_to_ptr.vmem [resolvable:$true] %s522_s7 }
 0x381   : > { %s676_s17 = sshll.u32 %s518_s16, 3  ;;  %s1330_s19 = sand.u32 1, %s929_s22  }
 0x382   : > { %s520_s0 = scalar_lea.hbm %s1292_s6, %s676_s17  ;;  %s490_s12 = scalar_lea.sflag [#allocation6], %s1330_s19 }
 0x383   : > { %s524_s1 = sshll.u32 %s520_s0, 4  ;;  %s855_s30 = scalar_lea.hbm %s1292_s6, 128  ;;  %s525_s1 = int_to_ptr.hbm [resolvable:$true] %s524_s1 }
 0x384   : > { %s849_s18 = sshra.s32 %s525_s1, 4  ;;  %s850_s18 = int_to_ptr.hbm [resolvable:$true] %s849_s18 }
 0x385   : > { %s851_s26 = scalar_lea.hbm %s850_s18, 8  ;;  %p856_p8 = scmp.lt.s32.totalorder %s850_s18, %s1292_s6 }
 0x386   : > { %p852_p4 = scmp.ne.s32.totalorder %s850_s18, %s851_s26  ;;  %p857_p9 = scmp.lt.s32.totalorder %s855_s30, %s851_s26 }
 0x388   : > { %p853_p6 = pnand %p852_p4, %p1125_p11  ;;  %p858_p10 = por %p857_p9, %p856_p8 }
 0x38a   : > { %p854_p5 = pneg %p853_p6 }
 0x38c   : > { %p859_p13 = pnand %p858_p10, %p854_p5 }
 0x38e   : > { %862 = shalt.err (!%p859_p13)
}
 0x38f   : > { %681 = dma.vmem_to_hbm [thread:$0]  (%p1125_p11), %s523_s7, 128, %s525_s1, %s490_s12  }
 0x390 PF: > { %s1331_s11 = sld [smem:[#allocation10_spill]]  ;;  %p691_p0 = scmp.ge.s32.totalorder %s973_s9, 2 }
 0x392   : > { %p685_p1 = pnand %p691_p0, %p1112_p7 }
 0x394   : > { %p686_p3 = pneg %p685_p1 }
 0x396   : > { %s536_s27 = sand.u32 1, %s1331_s11  }
 0x397   : > { %s537_s28 = scalar_lea.sflag [#allocation4], %s536_s27 }
 0x398   : > { %916 = dma.done.wait (%p686_p3), %s537_s28, 128  }
 0x399   : > { %918 = vsyncadd (%p686_p3), %s537_s28, 4294967168  ;;  %s1333_s16 = sld [smem:[#allocation9_spill]]  ;;  %p688_p2 = pnand %p691_p0, %p1131_p12 }
 0x39b   : > { %p689_p4 = pneg %p688_p2 }
 0x39f   : > { %s546_s17 = sand.u32 1, %s1333_s16  }
 0x3a0   : > { %s547_s15 = scalar_lea.sflag [#allocation6], %s546_s17 }
 0x3a1   : > { %920 = dma.done.wait (%p689_p4), %s547_s15, 128  }
 0x3a2   : > { %922 = vsyncadd (%p689_p4), %s547_s15, 4294967168  ;;  %s23_s9 = sadd.s32 1, %s973_s9   ;;  %s1335_s14 = sld [smem:[#allocation11_spill]] }
 0x3a3   : > { %p1242_p11 = scmp.ge.s32.totalorder %s23_s9, 18   ;;  %s1336_s26 = sld [smem:[#allocation19_spill]] }
 0x3a4   : > { %s1337_s27 = sld [smem:[#allocation12_spill]]  ;;  %s1344_s21 = smov %s929_s22 }
 0x3a5   : > { %s1338_s28 = sld [smem:[#allocation13_spill]]  ;;  %s1345_s22 = smov %s933_s23 }
 0x3a6   : > { %s1339_s29 = sld [smem:[#allocation14_spill]]  ;;  %s1346_s23 = smov %s1145_s24 }
 0x3a7   : > { %s1340_s30 = sld [smem:[#allocation15_spill]]  ;;  %s1347_s24 = smov %s941_s25 }
 0x3a8   : > { %s1341_s13 = sld [smem:[#allocation16_spill]]  ;;  %s1348_s25 = smov %s1335_s14 }
 0x3a9   : > { %s1342_s8 = sld [smem:[#allocation18_spill]] }
 0x3aa   :  { %22 = sbr.rel (!%p1242_p11) target bundleno = 14 (0xe), region = 104 }
 0x3ae   : > { %s1349_s7 = smov %s1341_s13 }
 0x3af   :  { %553 = vsyncpa [#allocation4], 1 }
 0x3b0   :  { %555 = vsyncpa [#allocation4 + $0x1], 1 }
 0x3b1   :  { %556 = vsyncpa [#allocation6], 1 }
 0x3b2   :  { %558 = vsyncpa [#allocation6 + $0x1], 1 }

</bundles_post_ra>
